<compile_context>
chip_gen: v5e
topology: v5e:2x2
jax: 0.10.0
libtpu: 0.0.40
codegen_flags: <defaults>
</compile_context>

<pallas_src>
import jax
import jax.numpy as jnp
from jax.experimental import pallas as pl
from jax.experimental.pallas import tpu as pltpu


def _cdiv(a: int, b: int) -> int:
    return -(-a // b)


def _round_up(x: int, m: int) -> int:
    return _cdiv(x, m) * m


def critic_kernel(x_ref, w1_ref, b1_ref, w2_ref, b2_ref, w3_ref, b3_ref, o_ref):
    # Layer 1: the concat arrives as a single (tb, Ds+Da) f32 tile; cast to the
    # compute dtype in-kernel (VPU cast hides under the MXU work).
    x = x_ref[...].astype(w1_ref.dtype)
    h1 = jnp.dot(x, w1_ref[...], preferred_element_type=jnp.float32) + b1_ref[...]
    h1 = jnp.maximum(h1, 0.0).astype(w2_ref.dtype)

    # Layer 2: the dominant (tb, H) @ (H, H) MXU matmul, f32 accumulation.
    h2 = jnp.dot(h1, w2_ref[...], preferred_element_type=jnp.float32) + b2_ref[...]
    h2 = jnp.maximum(h2, 0.0)                                     # (tb, H) f32

    # Layer 3 on the VPU/XLU instead of an N=1 MXU matmul: multiply by the
    # broadcast w3 row, lane-sum reduce, add the SMEM scalar bias.  Result is
    # a lane-major (tb,) vector -> lane-dense (1, tb) output store.
    q = jnp.sum(h2 * w3_ref[...], axis=-1) + b3_ref[0]            # (tb,) f32
    o_ref[...] = q[None, :].astype(o_ref.dtype)


def prepare_params(params, compute_dtype=jnp.bfloat16):
    """One-time weight prep (hoisted out of the per-step forward path).

    bf16 is the production compute dtype (MXU-native); use float32 only for
    correctness testing (f32 matmuls are multi-pass on the MXU).
    """
    w1, b1, w2, b2, w3, b3 = params
    H = w1.shape[-1]
    return (
        w1.astype(compute_dtype),               # (Ds+Da, H)
        b1.reshape(1, H).astype(jnp.float32),   # (1, H)
        w2.astype(compute_dtype),               # (H, H)
        b2.reshape(1, H).astype(jnp.float32),   # (1, H)
        w3.reshape(1, H).astype(jnp.float32),   # (1, H) row for the VPU layer 3
        b3.reshape(1).astype(jnp.float32),      # (1,) scalar -> SMEM
    )


def critic_forward(state, action, prepared_params, *, block_b=1024):
    """Pallas-backed Critic.forward(state, action) -> (B, 1) f32 Q-values.

    `prepared_params` comes from `prepare_params(params, ...)` and should be
    reused across steps.
    """
    w1_c, b1_f, w2_c, b2_f, w3_r, b3_s = prepared_params
    B = state.shape[0]
    Din, H = w1_c.shape

    # Fused concat: a (B, Ds+Da) concat is tiny and fuses with the pad below.
    x = jnp.concatenate([state, action], axis=-1)
    assert x.shape[1] == Din, "state_dim + action_dim mismatch with W1"

    # Batch tile: tb % 128 == 0 (lane-dense output row, bf16 sublane packing).
    # Force >= 2 (and even) grid tiles so the batch axis splits across both
    # TensorCores on v7x; keep tiles big so the ~0.35us/step overhead is
    # negligible.
    tb = min(block_b, _round_up(_cdiv(B, 2), 128))
    tb = max(128, _round_up(tb, 128))
    num_tiles = max(2, _cdiv(B, tb))
    if num_tiles % 2:
        num_tiles += 1
    padded_b = num_tiles * tb
    if padded_b != B:
        x = jnp.pad(x, ((0, padded_b - B), (0, 0)))

    const = lambda i: (0, 0)
    in_specs = [
        pl.BlockSpec((tb, Din), lambda i: (i, 0)),           # x tile (streams)
        pl.BlockSpec((Din, H), const),                       # W1 (resident)
        pl.BlockSpec((1, H), const),                         # b1
        pl.BlockSpec((H, H), const),                         # W2
        pl.BlockSpec((1, H), const),                         # b2
        pl.BlockSpec((1, H), const),                         # w3 row
        pl.BlockSpec(memory_space=pltpu.MemorySpace.SMEM),   # b3 scalar
    ]
    # Lane-dense output: each grid step writes one (1, tb) row chunk of a
    # (1, padded_b) slab (unmasked, full-lane stores).
    out_specs = pl.BlockSpec((1, tb), lambda i: (0, i))

    flops = 2 * padded_b * (Din * H + H * H + H)
    operands = (x, w1_c, b1_f, w2_c, b2_f, w3_r, b3_s)
    bytes_accessed = sum(int(a.size) * a.dtype.itemsize for a in operands)
    bytes_accessed += padded_b * 4  # output

    q_row = pl.pallas_call(
        critic_kernel,
        out_shape=jax.ShapeDtypeStruct((1, padded_b), jnp.float32),
        grid=(num_tiles,),
        in_specs=in_specs,
        out_specs=out_specs,
        compiler_params=pltpu.CompilerParams(
            dimension_semantics=("parallel",),
            # Headroom for large batch tiles; v5e's scoped default is 16 MiB.
            vmem_limit_bytes=32 * 1024 * 1024,
        ),
        cost_estimate=pl.CostEstimate(
            flops=flops, transcendentals=0, bytes_accessed=bytes_accessed),
    )(*operands)

    return q_row.reshape(padded_b, 1)[:B]


def init_linear(key, fan_in, fan_out):
    """Deterministic PyTorch-style Linear init: U(-1/sqrt(fan_in), 1/sqrt(fan_in))."""
    kw, kb = jax.random.split(key)
    bound = 1.0 / float(fan_in) ** 0.5
    w = jax.random.uniform(kw, (fan_in, fan_out), jnp.float32, -bound, bound)
    b = jax.random.uniform(kb, (1, fan_out), jnp.float32, -bound, bound)
    return w, b


def make_params(key, state_dim, action_dim, hidden_dim=256):
    k1, k2, k3 = jax.random.split(key, 3)
    w1, b1 = init_linear(k1, state_dim + action_dim, hidden_dim)
    w2, b2 = init_linear(k2, hidden_dim, hidden_dim)
    w3, b3 = init_linear(k3, hidden_dim, 1)
    return (w1, b1, w2, b2, w3, b3)


def critic_reference(state, action, params):
    """Pure-JAX f32 reference (highest matmul precision) for correctness checks."""
    w1, b1, w2, b2, w3, b3 = params
    hp = jax.lax.Precision.HIGHEST
    x = jnp.concatenate([state, action], axis=-1)
    h1 = jnp.maximum(jnp.dot(x, w1, precision=hp) + b1, 0.0)
    h2 = jnp.maximum(jnp.dot(h1, w2, precision=hp) + b2, 0.0)
    return jnp.dot(h2, w3, precision=hp) + b3


if __name__ == "__main__":
    batch, state_dim, action_dim = 8, 16, 4

    key = jax.random.PRNGKey(0)
    k_params, k_state, k_action = jax.random.split(key, 3)

    params = make_params(k_params, state_dim, action_dim)
    state = jax.random.normal(k_state, (batch, state_dim), jnp.float32)
    action = jax.random.normal(k_action, (batch, action_dim), jnp.float32)

    q_ref = jax.block_until_ready(critic_reference(state, action, params))

    # f32 compute path: correctness check only (bf16 is the production path).
    prep_f32 = prepare_params(params, compute_dtype=jnp.float32)
    q_f32 = jax.block_until_ready(critic_forward(state, action, prep_f32))
    assert q_f32.shape == (batch, 1)
    assert jnp.allclose(q_f32, q_ref, atol=1e-4, rtol=1e-4)

    # Production bf16 path (MXU-native), prepared weights reused across calls.
    prep_bf16 = prepare_params(params)
    q_bf16 = jax.block_until_ready(critic_forward(state, action, prep_bf16))
    assert q_bf16.shape == (batch, 1)
    assert jnp.allclose(q_bf16, q_ref, atol=5e-2, rtol=5e-2)

    # Multi-tile grid + remainder padding path (B=200 -> 2 tiles of 128).
    big_b = 200
    kb_s, kb_a = jax.random.split(jax.random.PRNGKey(1))
    state_b = jax.random.normal(kb_s, (big_b, state_dim), jnp.float32)
    action_b = jax.random.normal(kb_a, (big_b, action_dim), jnp.float32)
    q_big = jax.block_until_ready(
        critic_forward(state_b, action_b, prep_f32, block_b=128))
    q_big_ref = jax.block_until_ready(critic_reference(state_b, action_b, params))
    assert q_big.shape == (big_b, 1)
    assert jnp.allclose(q_big, q_big_ref, atol=1e-4, rtol=1e-4)

    print("KERNEL_OK")
</pallas_src>

<mosaic_0001>
module attributes {stable_mosaic.version = 11 : i64} {
  func.func @critic_kernel(%arg0: i32, %arg1: memref<128x20xf32, #tpu.memory_space<vmem>>, %arg2: memref<20x256xf32, #tpu.memory_space<vmem>>, %arg3: memref<1x256xf32, #tpu.memory_space<vmem>>, %arg4: memref<256x256xf32, #tpu.memory_space<vmem>>, %arg5: memref<1x256xf32, #tpu.memory_space<vmem>>, %arg6: memref<1x256xf32, #tpu.memory_space<vmem>>, %arg7: memref<1xf32, #tpu.memory_space<smem>>, %arg8: memref<1x128xf32, #tpu.memory_space<vmem>>) attributes {dimension_semantics = [#tpu.dimension_semantics<parallel>], iteration_bounds = array<i64: 2>, scalar_prefetch = 0 : i64, scratch_operands = 0 : i64, tpu.core_type = #tpu.core_type<tc>, window_params = [{transform_indices = @transform_0, window_bounds = array<i64: 128, 20>}, {pipeline_mode = #tpu.pipeline_mode<synchronous>, transform_indices = @transform_1, window_bounds = array<i64: 20, 256>}, {pipeline_mode = #tpu.pipeline_mode<synchronous>, transform_indices = @transform_2, window_bounds = array<i64: 1, 256>}, {pipeline_mode = #tpu.pipeline_mode<synchronous>, transform_indices = @transform_3, window_bounds = array<i64: 256, 256>}, {pipeline_mode = #tpu.pipeline_mode<synchronous>, transform_indices = @transform_4, window_bounds = array<i64: 1, 256>}, {pipeline_mode = #tpu.pipeline_mode<synchronous>, transform_indices = @transform_5, window_bounds = array<i64: 1, 256>}, {transform_indices = @transform_6, window_bounds = array<i64: 1>}, {transform_indices = @transform_7, window_bounds = array<i64: 1, 128>}]} {
    %c0 = arith.constant 0 : index
    %c0_0 = arith.constant 0 : index
    %0 = vector.load %arg1[%c0, %c0_0] : memref<128x20xf32, #tpu.memory_space<vmem>>, vector<128x20xf32>
    %c0_1 = arith.constant 0 : index
    %c0_2 = arith.constant 0 : index
    %1 = vector.load %arg2[%c0_1, %c0_2] : memref<20x256xf32, #tpu.memory_space<vmem>>, vector<20x256xf32>
    %cst = arith.constant dense<0.000000e+00> : vector<128x256xf32>
    %2 = tpu.matmul %0, %1, %cst {dimension_numbers = #tpu.dot_dimension_numbers<[1], [0], [0], [1], [0, 0, 1, 1], [], []>} : vector<128x20xf32>, vector<20x256xf32>, vector<128x256xf32> -> vector<128x256xf32>
    %c0_3 = arith.constant 0 : index
    %c0_4 = arith.constant 0 : index
    %3 = vector.load %arg3[%c0_3, %c0_4] : memref<1x256xf32, #tpu.memory_space<vmem>>, vector<1x256xf32>
    %4 = vector.broadcast %3 : vector<1x256xf32> to vector<128x256xf32>
    %5 = arith.addf %2, %4 : vector<128x256xf32>
    %cst_5 = arith.constant 0.000000e+00 : f32
    %6 = vector.broadcast %cst_5 : f32 to vector<128x256xf32>
    %7 = arith.maximumf %5, %6 : vector<128x256xf32>
    %c0_6 = arith.constant 0 : index
    %c0_7 = arith.constant 0 : index
    %8 = vector.load %arg4[%c0_6, %c0_7] : memref<256x256xf32, #tpu.memory_space<vmem>>, vector<256x256xf32>
    %cst_8 = arith.constant dense<0.000000e+00> : vector<128x256xf32>
    %9 = tpu.matmul %7, %8, %cst_8 {dimension_numbers = #tpu.dot_dimension_numbers<[1], [0], [0], [1], [0, 0, 1, 1], [], []>} : vector<128x256xf32>, vector<256x256xf32>, vector<128x256xf32> -> vector<128x256xf32>
    %c0_9 = arith.constant 0 : index
    %c0_10 = arith.constant 0 : index
    %10 = vector.load %arg5[%c0_9, %c0_10] : memref<1x256xf32, #tpu.memory_space<vmem>>, vector<1x256xf32>
    %11 = vector.broadcast %10 : vector<1x256xf32> to vector<128x256xf32>
    %12 = arith.addf %9, %11 : vector<128x256xf32>
    %cst_11 = arith.constant 0.000000e+00 : f32
    %13 = vector.broadcast %cst_11 : f32 to vector<128x256xf32>
    %14 = arith.maximumf %12, %13 : vector<128x256xf32>
    %c0_12 = arith.constant 0 : index
    %c0_13 = arith.constant 0 : index
    %15 = vector.load %arg6[%c0_12, %c0_13] : memref<1x256xf32, #tpu.memory_space<vmem>>, vector<1x256xf32>
    %16 = vector.broadcast %15 : vector<1x256xf32> to vector<128x256xf32>
    %17 = arith.mulf %14, %16 : vector<128x256xf32>
    %cst_14 = arith.constant dense<0.000000e+00> : vector<128xf32>
    %18 = vector.multi_reduction <add>, %17, %cst_14 [1] : vector<128x256xf32> to vector<128xf32>
    %c0_15 = arith.constant 0 : index
    %19 = memref.load %arg7[%c0_15] : memref<1xf32, #tpu.memory_space<smem>>
    %20 = vector.broadcast %19 : f32 to vector<128xf32>
    %21 = arith.addf %18, %20 : vector<128xf32>
    %22 = vector.shape_cast %21 : vector<128xf32> to vector<1x128xf32>
    %c0_16 = arith.constant 0 : index
    %c0_17 = arith.constant 0 : index
    %23 = vector.load %arg8[%c0_16, %c0_17] : memref<1x128xf32, #tpu.memory_space<vmem>>, vector<1x128xf32>
    tpu.vector_store %arg8[%c0_16, %c0_17], %22 {strides = array<i32>} : memref<1x128xf32, #tpu.memory_space<vmem>>, vector<1x128xf32>,
    return
  }
  func.func @transform_0(%arg0: i32) -> (i32, i32) {
    %c0_i32 = arith.constant 0 : i32
    %c0_i32_0 = arith.constant 0 : i32
    return %arg0, %c0_i32 : i32, i32
  }
  func.func @transform_1(%arg0: i32) -> (i32, i32) {
    %c0_i32 = arith.constant 0 : i32
    %c0_i32_0 = arith.constant 0 : i32
    %c0_i32_1 = arith.constant 0 : i32
    return %c0_i32, %c0_i32_0 : i32, i32
  }
  func.func @transform_2(%arg0: i32) -> (i32, i32) {
    %c0_i32 = arith.constant 0 : i32
    %c0_i32_0 = arith.constant 0 : i32
    %c0_i32_1 = arith.constant 0 : i32
    return %c0_i32, %c0_i32_0 : i32, i32
  }
  func.func @transform_3(%arg0: i32) -> (i32, i32) {
    %c0_i32 = arith.constant 0 : i32
    %c0_i32_0 = arith.constant 0 : i32
    %c0_i32_1 = arith.constant 0 : i32
    return %c0_i32, %c0_i32_0 : i32, i32
  }
  func.func @transform_4(%arg0: i32) -> (i32, i32) {
    %c0_i32 = arith.constant 0 : i32
    %c0_i32_0 = arith.constant 0 : i32
    %c0_i32_1 = arith.constant 0 : i32
    return %c0_i32, %c0_i32_0 : i32, i32
  }
  func.func @transform_5(%arg0: i32) -> (i32, i32) {
    %c0_i32 = arith.constant 0 : i32
    %c0_i32_0 = arith.constant 0 : i32
    %c0_i32_1 = arith.constant 0 : i32
    return %c0_i32, %c0_i32_0 : i32, i32
  }
  func.func @transform_6(%arg0: i32) -> i32 {
    %c0_i32 = arith.constant 0 : i32
    %c0_i32_0 = arith.constant 0 : i32
    return %c0_i32 : i32
  }
  func.func @transform_7(%arg0: i32) -> (i32, i32) {
    %c0_i32 = arith.constant 0 : i32
    %c0_i32_0 = arith.constant 0 : i32
    return %c0_i32, %arg0 : i32, i32
  }
}

</mosaic_0001>

<bundles_post_ra>
// kernel: tpu_custom_call.1
= control target key start
LH: loop header
LB: loop body
LE: loop exit
PB: predicated region body
PF: predicated region fallthrough
CT: control target
= control target key end

     0   :  { %s1809_s0 = inlined_call_operand.vmem [shape: f32[256,20], index: 0, kind: input, shape index: {}]   ;;  %s1810_s1 = inlined_call_operand.vmem [shape: f32[20,256], index: 1, kind: input, shape index: {}]   ;;  %s1811_s2 = inlined_call_operand.vmem [shape: f32[1,256], index: 2, kind: input, shape index: {}]   ;;  %s1812_s3 = inlined_call_operand.hbm [shape: f32[256,256], index: 3, kind: input, shape index: {}]   ;;  %s1813_s4 = inlined_call_operand.vmem [shape: f32[1,256], index: 4, kind: input, shape index: {}]   ;;  %s1814_s5 = inlined_call_operand.vmem [shape: f32[1,256], index: 5, kind: input, shape index: {}]   ;;  %s1815_s6 = inlined_call_operand.<no memory space> [shape: f32[1], index: 6, kind: input, shape index: {}]   ;;  %s1816_s7 = inlined_call_operand.hbm [shape: f32[1,256], index: 7, kind: output, shape index: {}]  }
   0x1   :  { %12 = sst [smem:[#allocation2]] %s1815_s6 }
   0x2   :  { %13 = vsyncpa [#allocation4], 0 }
   0x3   :  { %14 = vsyncpa [#allocation5], 0 }
   0x4   :  { %16 = vsyncpa [#allocation5 + $0x1], 0  ;;  %s1431_s26 = smov 0   ;;  %s1433_s27 = smov 0  }
   0x5   :  { %s1435_s28 = smov 0   ;;  %s1437_s29 = smov 0  }
   0x6 LB: > { %s1452_s6 = sadd.s32 4294967295, %s1383_s29   ;;  %s1169_s30 = sadd.s32 4294967294, %s1383_s29   ;;  %s1383_s29 = sphi %s1437_s29, %s1822_s29   ;;  %s1379_s28 = sphi %s1435_s28, %s1821_s28   ;;  %s1375_s27 = sphi %s1433_s27, %s1820_s27   ;;  %s1371_s26 = sphi %s1431_s26, %s1819_s26  }
   0x7   : > { %s1456_s8 = sadd.s32 1, %s1383_s29   ;;  %s181_s9 = sadd.s32 1, %s1379_s28 }
   0x8   : > { %s178_s10 = ssub.s32 %s1383_s29, %s1456_s8  ;;  %p191_p0 = scmp.ne.s32.totalorder %s1379_s28, %s1375_s27 }
   0x9   : > { %p179_p1 = scmp.eq.s32.totalorder %s178_s10, 0  ;;  %p192_p2 = scmp.eq.s32.totalorder %s1452_s6, 1 }
   0xa   : > { %p197_p3 = scmp.ne.s32.totalorder %s1375_s27, %s1371_s26  ;;  %p198_p4 = scmp.eq.s32.totalorder %s1169_s30, 1 }
   0xb   : > { %s1467_s11 = scalar_select %p179_p1, %s1379_s28, %s181_s9  }
   0xc   : > { %p1469_p5 = por %p192_p2, %p191_p0  ;;  %p1473_p6 = por %p198_p4, %p197_p3 }
   0xd   : > { %p1170_p7 = scmp.ge.s32.totalorder %s1383_s29, 1  ;;  %p205_p8 = scmp.lt.s32.totalorder %s1383_s29, 3 }
   0xe   : > { %p1249_p9 = scmp.eq.s32.totalorder %s1452_s6, 0  ;;  %s222_s16 = sshll.u32 %s1812_s3, 4  ;;  %s223_s16 = int_to_ptr.hbm [resolvable:$true] %s222_s16 }
   0xf   : > { %p206_p10 = pnand %p1170_p7, %p205_p8  ;;  %s1385_s17 = smov [#allocation3]  }
  0x10   : > { %s224_s18 = sshll.u32 %s1385_s17, 4  ;;  %s1386_s19 = smov 256   ;;  %s225_s18 = int_to_ptr.vmem [resolvable:$true] %s224_s18 }
  0x11   : > { %p1241_p11 = pneg %p206_p10  ;;  %s1387_s20 = smov 16  }
  0x12   : > { %258 = sbr.rel (%p206_p10) target bundleno = 555 (0x22b), region = 48 }
  0x13   : > { %p1242_p12 = pnand %p1249_p9, %p1241_p11 }
  0x15   : > { %1244 = dma.hbm_to_vmem [thread:$0]  (!%p1242_p12), %s223_s16, 8192, %s225_s18, [#allocation4], %s1386_s19, %s1386_s19, %s1387_s20  }
  0x17   : > { %1362 = dma.done.wait (%p1249_p9), [#allocation4], 8192  }
  0x18   : > { %1364 = vsyncadd (%p1249_p9), [#allocation4], 4294959104  ;;  %s1175_s21 = sshll.u32 %s1452_s6, 4  ;;  %vm373_vm0 = vcmask 1043456   ;;  %v316_v0 = vld [vmem:[%s1810_s1 + $0x20] sm:$0xf]  ;;  %s1098_s18 = scalar_lea.hbm %s1816_s7, %s1452_s6 }
  0x19   : > { %p291_p13 = scmp.lt.s32.totalorder %s1175_s21, 31  ;;  %v314_v1 = vld [vmem:[%s1810_s1 + $0x10] sm:$0xff]  ;;  %v317_v2 = vld [vmem:[%s1810_s1 + $0x28] sm:$0xf]  ;;  %1177 = vmatpush.msk.msra.mxu0 %vm373_vm0, %v316_v0  ;;  %v315_v3 = vld [vmem:[%s1810_s1 + $0x18] sm:$0xff]  ;;  %1213 = vmatpush.msk.msra.mxu2 %vm373_vm0, %v316_v0  ;;  %vm324_vm1 = vcmask 162816  }
  0x1a   : > { %1194 = vmatpush.msk.msra.mxu1 %vm373_vm0, %v317_v2  ;;  %v312_v4 = vld [vmem:[%s1810_s1] sm:$0xff]  ;;  %v313_v5 = vld [vmem:[%s1810_s1 + $0x8] sm:$0xff]  ;;  %1216 = vmatpush.msk.msra.mxu3 %vm373_vm0, %v317_v2  ;;  %v572_v13 = vld [vmem:[#allocation3 + $0xf0] sm:$0xff]  ;;  %s990_s14 = sld [smem:[#allocation2]]  ;;  %vm1029_vm2 = vcmask 130112   ;;  %vm1033_vm3 = vcmask 195712  }
  0x1b   : > { %s1824_s21 = smov (!%p291_p13, %s1175_s21), 31  ;;  %394 = vmatpush.msra.mxu0 %v314_v1  ;;  %1214 = vmatpush.msra.mxu2 %v314_v1  ;;  %v604_v14 = vld [vmem:[#allocation3 + $0x1f0] sm:$0xff]  ;;  %v570_v15 = vld [vmem:[#allocation3 + $0xe0] sm:$0xff]  ;;  %v1536_v16 = vld [vmem:[#allocation3 + $0xf8] sm:$0xff]  ;;  %vm1037_vm4 = vcmask 261312   ;;  %vm1041_vm5 = vcmask 326912  }
  0x1c   : > { %s1176_s22 = sshll.u32 %s1824_s21, 3  ;;  %459 = vmatpush.msra.mxu1 %v315_v3  ;;  %1217 = vmatpush.msra.mxu3 %v315_v3  ;;  %v602_v17 = vld [vmem:[#allocation3 + $0x1e0] sm:$0xff]  ;;  %v568_v18 = vld [vmem:[#allocation3 + $0xd0] sm:$0xff]  ;;  %v605_v19 = vld [vmem:[#allocation3 + $0x1f8] sm:$0xff]  ;;  %vm1045_vm6 = vcmask 392512   ;;  %vm1049_vm7 = vcmask 458112  }
  0x1d   : > { %s1502_s16 = scalar_lea.vmem %s1809_s0, %s1176_s22  ;;  %395 = vmatpush.msra.mxu0 %v312_v4  ;;  %1215 = vmatpush.msra.mxu2 %v312_v4  ;;  %v600_v20 = vld [vmem:[#allocation3 + $0x1d0] sm:$0xff]  ;;  %v1539_v21 = vld [vmem:[#allocation3 + $0xe8] sm:$0xff]  ;;  %v1543_v24 = vld [vmem:[#allocation3 + $0xd8] sm:$0xff]  ;;  %vm1053_vm8 = vcmask 523712   ;;  %vm1057_vm9 = vcmask 589312   ;;  %vm1061_vm10 = vcmask 654912  }
  0x1e   : > { %v296_v6 = vld [vmem:[%s1502_s16] sm:$0xff]  ;;  %460 = vmatpush.msra.mxu1 %v313_v5  ;;  %1218 = vmatpush.msra.mxu3 %v313_v5  ;;  %v297_v7 = vld [vmem:[%s1502_s16 + $0x8] sm:$0xff]  ;;  %v298_v8 = vld [vmem:[%s1502_s16 + $0x10] sm:$0xff]  ;;  %s288_s15 = sand.u32 1, %s1375_s27   ;;  %vm1065_vm11 = vcmask 720512   ;;  %vm1069_vm12 = vcmask 786112  }
  0x1f   : > { %1178 = vmatmul.msk.f32.vlgmr.msra.gmra.mxu0 %vm324_vm1, %v296_v6  ;;  %1195 = vmatmul.msk.f32.vlgmr.msra.gmra.mxu1 %vm324_vm1, %v296_v6  ;;  %v299_v9 = vld [vmem:[%s1502_s16 + $0x18] sm:$0xff]  ;;  %v1526_v10 = vld [vmem:[%s1502_s16 + $0x40] sm:$0xff]  ;;  %v305_v12 = vld [vmem:[%s1502_s16 + $0x48] sm:$0xff]  ;;  %vm1073_vm13 = vcmask 851712   ;;  %vm1077_vm14 = vcmask 917312   ;;  %vm1081_vm15 = vcmask 982912  }
  0x20   : > { %1203 = vmatmul.msk.f32.vlgmr.msra.gmra.mxu3 %vm324_vm1, %v1526_v10  ;;  %v300_v11 = vld [vmem:[%s1502_s16 + $0x20] sm:$0xff]  ;;  %1187 = vmatmul.msk.f32.vlgmr.msra.gmra.mxu2 %vm324_vm1, %v305_v12  ;;  %v603_v22 = vld [vmem:[#allocation3 + $0x1e8] sm:$0xff]  ;;  %v306_v25 = vld [vmem:[%s1502_s16 + $0x50] sm:$0xff]  ;;  %s289_s19 = scalar_lea.vmem [#allocation6], %s288_s15  ;;  %s1102_s6 = sshll.u32 %s1098_s18, 4  ;;  %vm1085_vm0 = vcmask 1048512   ;;  %s1103_s6 = int_to_ptr.hbm [resolvable:$true] %s1102_s6 }
  0x21   : > { %612 = vmatpush.msrb.mxu2 %v572_v13  ;;  %677 = vmatpush.msrb.mxu3 %v604_v14  ;;  %v301_v23 = vld [vmem:[%s1502_s16 + $0x28] sm:$0xff]  ;;  %v566_v26 = vld [vmem:[#allocation3 + $0xc0] sm:$0xff]  ;;  %v601_v28 = vld [vmem:[#allocation3 + $0x1d8] sm:$0xff]  ;;  %s1100_s20 = sshll.u32 %s289_s19, 4  ;;  %s1090_s21 = scalar_lea.sflag [#allocation5], %s288_s15  ;;  %s1101_s20 = int_to_ptr.vmem [resolvable:$true] %s1100_s20 }
  0x22   : > { %742 = vmatpush.msrb.mxu0 %v1536_v16  ;;  %807 = vmatpush.msrb.mxu1 %v605_v19  ;;  %v598_v27 = vld [vmem:[#allocation3 + $0x1c0] sm:$0xff]  ;;  %v1549_v29 = vld [vmem:[#allocation3 + $0xc8] sm:$0xff]  ;;  %v564_v30 = vld [vmem:[#allocation3 + $0xb0] sm:$0xff]  ;;  %s1331_s23 = sshra.s32 %s1103_s6, 4  ;;  %s1337_s30 = scalar_lea.hbm %s1816_s7, 2  ;;  %s1332_s23 = int_to_ptr.hbm [resolvable:$true] %s1331_s23 }
  0x23   : > { %613 = vmatpush.msrb.mxu2 %v570_v15  ;;  %678 = vmatpush.msrb.mxu3 %v602_v17  ;;  %v596_v31 = vld [vmem:[#allocation3 + $0x1b0] sm:$0xff]  ;;  %v599_v32 = vld [vmem:[#allocation3 + $0x1c8] sm:$0xff]  ;;  %v1553_v33 = vld [vmem:[#allocation3 + $0xb8] sm:$0xff]  ;;  %s1333_s22 = scalar_lea.hbm %s1332_s23, 1  ;;  %p1338_p3 = scmp.lt.s32.totalorder %s1332_s23, %s1816_s7 }
  0x24   : > { %743 = vmatpush.msrb.mxu0 %v1539_v21  ;;  %808 = vmatpush.msrb.mxu1 %v603_v22  ;;  %v562_v34 = vld [vmem:[#allocation3 + $0xa0] sm:$0xff]  ;;  %v597_v36 = vld [vmem:[#allocation3 + $0x1b8] sm:$0xff]  ;;  %v1556_v37 = vld [vmem:[#allocation3 + $0xa8] sm:$0xff]  ;;  %p1334_p0 = scmp.ne.s32.totalorder %s1332_s23, %s1333_s22  ;;  %p1339_p4 = scmp.lt.s32.totalorder %s1337_s30, %s1333_s22 }
  0x25   : > { %614 = vmatpush.msrb.mxu2 %v568_v18  ;;  %679 = vmatpush.msrb.mxu3 %v600_v20  ;;  %v594_v35 = vld [vmem:[#allocation3 + $0x1a0] sm:$0xff]  ;;  %v302_v38 = vld [vmem:[%s1502_s16 + $0x30] sm:$0xff]  ;;  %v307_v39 = vld [vmem:[%s1502_s16 + $0x58] sm:$0xff] }
  0x26   : > { %744 = vmatpush.msrb.mxu0 %v1543_v24  ;;  %809 = vmatpush.msrb.mxu1 %v601_v28  ;;  %v560_v40 = vld [vmem:[#allocation3 + $0x90] sm:$0xff]  ;;  %v595_v42 = vld [vmem:[#allocation3 + $0x1a8] sm:$0xff]  ;;  %v1564_v43 = vld [vmem:[#allocation3 + $0x98] sm:$0xff]  ;;  %p1335_p1 = pnand %p1334_p0, %p1469_p5  ;;  %p1340_p7 = por %p1339_p4, %p1338_p3 }
  0x27   : > { %1179 = vmatmul.msk.f32.gmra.mxu0 %vm324_vm1, %v297_v7  ;;  %1196 = vmatmul.msk.f32.gmra.mxu1 %vm324_vm1, %v297_v7  ;;  %v592_v41 = vld [vmem:[#allocation3 + $0x190] sm:$0xff]  ;;  %v558_v44 = vld [vmem:[#allocation3 + $0x80] sm:$0xff]  ;;  %v593_v46 = vld [vmem:[#allocation3 + $0x198] sm:$0xff] }
  0x28   : > { %1204 = vmatmul.msk.f32.gmra.mxu3 %vm324_vm1, %v305_v12  ;;  %1188 = vmatmul.msk.f32.gmra.mxu2 %vm324_vm1, %v306_v25  ;;  %v590_v45 = vld [vmem:[#allocation3 + $0x180] sm:$0xff]  ;;  %v1568_v47 = vld [vmem:[#allocation3 + $0x88] sm:$0xff]  ;;  %v556_v48 = vld [vmem:[#allocation3 + $0x70] sm:$0xff]  ;;  %p1336_p2 = pneg %p1335_p1 }
  0x29   : > { %615 = vmatpush.msrb.mxu2 %v566_v26  ;;  %680 = vmatpush.msrb.mxu3 %v598_v27  ;;  %v588_v49 = vld [vmem:[#allocation3 + $0x170] sm:$0xff]  ;;  %v591_v50 = vld [vmem:[#allocation3 + $0x188] sm:$0xff]  ;;  %v1571_v51 = vld [vmem:[#allocation3 + $0x78] sm:$0xff] }
  0x2a   : > { %745 = vmatpush.msrb.mxu0 %v1549_v29  ;;  %810 = vmatpush.msrb.mxu1 %v599_v32  ;;  %v303_v52 = vld [vmem:[%s1502_s16 + $0x38] sm:$0xff]  ;;  %v308_v53 = vld [vmem:[%s1502_s16 + $0x60] sm:$0xff]  ;;  %v1579_v57 = vld [vmem:[#allocation3 + $0x68] sm:$0xff]  ;;  %p1341_p8 = pnand %p1340_p7, %p1336_p2 }
  0x2b   : > { %616 = vmatpush.msrb.mxu2 %v564_v30  ;;  %681 = vmatpush.msrb.mxu3 %v596_v31  ;;  %v554_v54 = vld [vmem:[#allocation3 + $0x60] sm:$0xff]  ;;  %v589_v56 = vld [vmem:[#allocation3 + $0x178] sm:$0xff]  ;;  %v552_v58 = vld [vmem:[#allocation3 + $0x50] sm:$0xff] }
  0x2c   : > { %746 = vmatpush.msrb.mxu0 %v1553_v33  ;;  %811 = vmatpush.msrb.mxu1 %v597_v36  ;;  %v586_v55 = vld [vmem:[#allocation3 + $0x160] sm:$0xff]  ;;  %v584_v59 = vld [vmem:[#allocation3 + $0x150] sm:$0xff]  ;;  %v587_v60 = vld [vmem:[#allocation3 + $0x168] sm:$0xff] }
  0x2d   : > { %617 = vmatpush.msrb.mxu2 %v562_v34  ;;  %682 = vmatpush.msrb.mxu3 %v594_v35  ;;  %v1583_v61 = vld [vmem:[#allocation3 + $0x58] sm:$0xff]  ;;  %v550_v62 = vld [vmem:[#allocation3 + $0x40] sm:$0xff]  ;;  %v1586_v0 = vld [vmem:[#allocation3 + $0x48] sm:$0xff] }
  0x2e   : > { %747 = vmatpush.msrb.mxu0 %v1556_v37  ;;  %812 = vmatpush.msrb.mxu1 %v595_v42  ;;  %v582_v63 = vld [vmem:[#allocation3 + $0x140] sm:$0xff]  ;;  %v585_v1 = vld [vmem:[#allocation3 + $0x158] sm:$0xff]  ;;  %v548_v2 = vld [vmem:[#allocation3 + $0x30] sm:$0xff] }
  0x2f   : > { %1180 = vmatmul.msk.f32.gmra.mxu0 %vm324_vm1, %v298_v8  ;;  %1197 = vmatmul.msk.f32.gmra.mxu1 %vm324_vm1, %v298_v8  ;;  %v309_v3 = vld [vmem:[%s1502_s16 + $0x68] sm:$0xff]  ;;  %v546_v4 = vld [vmem:[#allocation3 + $0x20] sm:$0xff]  ;;  %v549_v5 = vld [vmem:[#allocation3 + $0x38] sm:$0xff] }
  0x30   : > { %1205 = vmatmul.msk.f32.gmra.mxu3 %vm324_vm1, %v306_v25  ;;  %1189 = vmatmul.msk.f32.gmra.mxu2 %vm324_vm1, %v307_v39  ;;  %v583_v6 = vld [vmem:[#allocation3 + $0x148] sm:$0xff]  ;;  %v580_v7 = vld [vmem:[#allocation3 + $0x130] sm:$0xff]  ;;  %v581_v12 = vld [vmem:[#allocation3 + $0x138] sm:$0xff] }
  0x31   : > { %618 = vmatpush.msrb.mxu2 %v560_v40  ;;  %683 = vmatpush.msrb.mxu3 %v592_v41  ;;  %v544_v8 = vld [vmem:[#allocation3 + $0x10] sm:$0xff]  ;;  %v578_v13 = vld [vmem:[#allocation3 + $0x120] sm:$0xff]  ;;  %v545_v14 = vld [vmem:[#allocation3 + $0x18] sm:$0xff] }
  0x32   : > { %748 = vmatpush.msrb.mxu0 %v1564_v43  ;;  %813 = vmatpush.msrb.mxu1 %v593_v46  ;;  %v579_v15 = vld [vmem:[#allocation3 + $0x128] sm:$0xff]  ;;  %v542_v17 = vld [vmem:[#allocation3] sm:$0xff]  ;;  %v576_v18 = vld [vmem:[#allocation3 + $0x110] sm:$0xff] }
  0x33   : > { %619 = vmatpush.msrb.mxu2 %v558_v44  ;;  %684 = vmatpush.msrb.mxu3 %v590_v45  ;;  %v543_v19 = vld [vmem:[#allocation3 + $0x8] sm:$0xff]  ;;  %v577_v20 = vld [vmem:[#allocation3 + $0x118] sm:$0xff]  ;;  %v574_v22 = vld [vmem:[#allocation3 + $0x100] sm:$0xff] }
  0x34   : > { %749 = vmatpush.msrb.mxu0 %v1568_v47  ;;  %814 = vmatpush.msrb.mxu1 %v591_v50 }
  0x35   : > { %620 = vmatpush.msrb.mxu2 %v556_v48  ;;  %685 = vmatpush.msrb.mxu3 %v588_v49 }
  0x36   : > { %750 = vmatpush.msrb.mxu0 %v1571_v51  ;;  %815 = vmatpush.msrb.mxu1 %v589_v56 }
  0x37   : > { %1181 = vmatmul.msk.f32.gmra.mxu0 %vm324_vm1, %v299_v9  ;;  %1198 = vmatmul.msk.f32.gmra.mxu1 %vm324_vm1, %v299_v9  ;;  %v310_v9 = vld [vmem:[%s1502_s16 + $0x70] sm:$0xff] }
  0x38   : > { %1206 = vmatmul.msk.f32.gmra.mxu3 %vm324_vm1, %v307_v39  ;;  %1190 = vmatmul.msk.f32.gmra.mxu2 %vm324_vm1, %v308_v53 }
  0x39   : > { %621 = vmatpush.msrb.mxu2 %v554_v54  ;;  %686 = vmatpush.msrb.mxu3 %v586_v55 }
  0x3a   : > { %751 = vmatpush.msrb.mxu0 %v1579_v57  ;;  %816 = vmatpush.msrb.mxu1 %v587_v60 }
  0x3b   : > { %622 = vmatpush.msrb.mxu2 %v552_v58  ;;  %687 = vmatpush.msrb.mxu3 %v584_v59 }
  0x3c   : > { %752 = vmatpush.msrb.mxu0 %v1583_v61  ;;  %817 = vmatpush.msrb.mxu1 %v585_v1 }
  0x3d   : > { %623 = vmatpush.msrb.mxu2 %v550_v62  ;;  %688 = vmatpush.msrb.mxu3 %v582_v63 }
  0x3e   : > { %753 = vmatpush.msrb.mxu0 %v1586_v0  ;;  %818 = vmatpush.msrb.mxu1 %v583_v6 }
  0x3f   : > { %1182 = vmatmul.msk.f32.gmra.mxu0 %vm324_vm1, %v300_v11  ;;  %1199 = vmatmul.msk.f32.gmra.mxu1 %vm324_vm1, %v300_v11  ;;  %v311_v11 = vld [vmem:[%s1502_s16 + $0x78] sm:$0xff] }
  0x40   : > { %1207 = vmatmul.msk.f32.gmra.mxu3 %vm324_vm1, %v308_v53  ;;  %624 = vmatpush.msrb.mxu2 %v548_v2 }
  0x41   : > { %1191 = vmatmul.msk.f32.gmra.mxu2 %vm324_vm1, %v309_v3  ;;  %754 = vmatpush.msrb.mxu0 %v549_v5 }
  0x42   : > { %625 = vmatpush.msrb.mxu2 %v546_v4  ;;  %689 = vmatpush.msrb.mxu3 %v580_v7 }
  0x43   : > { %819 = vmatpush.msrb.mxu1 %v581_v12 }
  0x44   : > { %626 = vmatpush.msrb.mxu2 %v544_v8  ;;  %690 = vmatpush.msrb.mxu3 %v578_v13 }
  0x45   : > { %820 = vmatpush.msrb.mxu1 %v579_v15 }
  0x46   : > { %627 = vmatpush.msrb.mxu2 %v542_v17  ;;  %691 = vmatpush.msrb.mxu3 %v576_v18 }
  0x47   : > { %1183 = vmatmul.msk.f32.gmra.mxu0 %vm324_vm1, %v301_v23  ;;  %1200 = vmatmul.msk.f32.gmra.mxu1 %vm324_vm1, %v301_v23  ;;  %v575_v23 = vld [vmem:[#allocation3 + $0x108] sm:$0xff] }
  0x48   : > { %1208 = vmatmul.msk.f32.gmra.mxu3 %vm324_vm1, %v309_v3  ;;  %821 = vmatpush.msrb.mxu1 %v577_v20 }
  0x49   : > { %1192 = vmatmul.msk.f32.gmra.mxu2 %vm324_vm1, %v310_v9  ;;  %692 = vmatpush.msrb.mxu3 %v574_v22 }
  0x4a   : > { %1219 = vmatpush.msra.mxu2 %v1536_v16  ;;  %822 = vmatpush.msrb.mxu1 %v575_v23  ;;  %v318_v16 = vld [vmem:[%s1811_s2] sm:$0x3] }
  0x4c   : > { %1220 = vmatpush.msra.mxu2 %v1539_v21  ;;  %v1616_v21 = vperm.slane %v318_v16, 0 }
  0x4e   : > { %1221 = vmatpush.msra.mxu2 %v1543_v24  ;;  %v1618_v24 = vperm.slane %v318_v16, 1 }
  0x4f   : > { %1184 = vmatmul.msk.f32.gmra.mxu0 %vm324_vm1, %v302_v38  ;;  %1201 = vmatmul.msk.f32.gmra.mxu1 %vm324_vm1, %v302_v38 }
  0x50   : > { %1209 = vmatmul.msk.f32.gmra.mxu3 %vm324_vm1, %v310_v9  ;;  %1222 = vmatpush.msra.mxu2 %v1549_v29 }
  0x51   : > { %1193 = vmatmul.msk.f32.gmra.mxu2 %vm324_vm1, %v311_v11 }
  0x52   : > { %1223 = vmatpush.msra.mxu2 %v1553_v33 }
  0x54   : > { %1224 = vmatpush.msra.mxu2 %v1556_v37 }
  0x56   : > { %1225 = vmatpush.msra.mxu2 %v1564_v43 }
  0x57   : > { %1185 = vmatmul.msk.f32.gmra.mxu0 %vm324_vm1, %v303_v52  ;;  %1202 = vmatmul.msk.f32.gmra.mxu1 %vm324_vm1, %v303_v52 }
  0x58   : > { %1210 = vmatmul.msk.f32.gmra.mxu3 %vm324_vm1, %v311_v11  ;;  %1226 = vmatpush.msra.mxu2 %v1568_v47 }
  0x5a   : > { %1227 = vmatpush.msra.mxu2 %v1571_v51 }
  0x5c   : > { %1228 = vmatpush.msra.mxu2 %v1579_v57 }
  0x5e   : > { %1229 = vmatpush.msra.mxu2 %v1583_v61 }
  0x5f   : > { %1186 = vmatmul.msk.f32.gmra.mxu0 %vm324_vm1, %v1526_v10  ;;  %v547_v10 = vld [vmem:[#allocation3 + $0x28] sm:$0xff] }
  0x60   : > { %755 = vmatpush.msrb.mxu0 %v547_v10  ;;  %1230 = vmatpush.msra.mxu2 %v1586_v0 }
  0x62   : > { %756 = vmatpush.msrb.mxu0 %v545_v14  ;;  %1231 = vmatpush.msra.mxu2 %v549_v5 }
  0x64   : > { %757 = vmatpush.msrb.mxu0 %v543_v19  ;;  %1232 = vmatpush.msra.mxu2 %v547_v10 }
  0x66   : > { %1233 = vmatpush.msra.mxu2 %v545_v14 }
  0x68   : > { %1234 = vmatpush.msra.mxu2 %v543_v19 }
  0x9c   : > { %v397_v25 = vpop.f32.mrf.mxu0  ;;  %v462_v26 = vpop.f32.mrf.mxu1 }
  0x9d   : > { %v398_v27 = vadd.f32 %v397_v25, %v1616_v21  ;;  %v463_v28 = vadd.f32 %v462_v26, %v1618_v24 }
  0x9f   : > { %v510_v29 = vmax.f32 %v398_v27, 0.0  ;;  %v511_v30 = vmax.f32 %v463_v28, 0.0 }
  0xa1   : > { %628 = vmatmul.f32.vlgmr.msrb.gmra.mxu2 %v510_v29  ;;  %758 = vmatmul.f32.vlgmr.msrb.gmra.mxu0 %v510_v29 }
  0xa2   : > { %693 = vmatmul.f32.vlgmr.msrb.gmra.mxu3 %v511_v30  ;;  %823 = vmatmul.f32.vlgmr.msrb.gmra.mxu1 %v511_v30 }
  0xa3   : > { %v486_v61 = vpop.f32.mrf.mxu3  ;;  %v424_v4 = vpop.f32.mrf.mxu2 }
  0xa4   : > { %v400_v31 = vpop.f32.mrf.mxu0  ;;  %v465_v32 = vpop.f32.mrf.mxu1  ;;  %v487_v12 = vadd.f32 %v486_v61, %v1618_v24  ;;  %v425_v20 = vadd.f32 %v424_v4, %v1616_v21 }
  0xa5   : > { %v401_v33 = vadd.f32 %v400_v31, %v1616_v21  ;;  %v466_v34 = vadd.f32 %v465_v32, %v1618_v24 }
  0xa6   : > { %v527_v18 = vmax.f32 %v487_v12, 0.0  ;;  %v528_v23 = vmax.f32 %v425_v20, 0.0 }
  0xa7   : > { %v512_v35 = vmax.f32 %v401_v33, 0.0  ;;  %v513_v36 = vmax.f32 %v466_v34, 0.0 }
  0xa9   : > { %631 = vmatmul.f32.gmra.mxu2 %v512_v35  ;;  %761 = vmatmul.f32.gmra.mxu0 %v512_v35 }
  0xaa   : > { %696 = vmatmul.f32.gmra.mxu3 %v513_v36  ;;  %826 = vmatmul.f32.gmra.mxu1 %v513_v36 }
  0xab   : > { %v489_v5 = vpop.f32.mrf.mxu3  ;;  %v427_v14 = vpop.f32.mrf.mxu2 }
  0xac   : > { %v403_v37 = vpop.f32.mrf.mxu0  ;;  %v468_v38 = vpop.f32.mrf.mxu1  ;;  %v490_v22 = vadd.f32 %v489_v5, %v1618_v24  ;;  %v428_v27 = vadd.f32 %v427_v14, %v1616_v21 }
  0xad   : > { %v404_v39 = vadd.f32 %v403_v37, %v1616_v21  ;;  %v469_v40 = vadd.f32 %v468_v38, %v1618_v24 }
  0xae   : > { %v529_v16 = vmax.f32 %v490_v22, 0.0  ;;  %v530_v29 = vmax.f32 %v428_v27, 0.0 }
  0xaf   : > { %v514_v41 = vmax.f32 %v404_v39, 0.0  ;;  %v515_v42 = vmax.f32 %v469_v40, 0.0 }
  0xb1   : > { %634 = vmatmul.f32.gmra.mxu2 %v514_v41  ;;  %764 = vmatmul.f32.gmra.mxu0 %v514_v41 }
  0xb2   : > { %699 = vmatmul.f32.gmra.mxu3 %v515_v42  ;;  %829 = vmatmul.f32.gmra.mxu1 %v515_v42 }
  0xb3   : > { %v492_v17 = vpop.f32.mrf.mxu3  ;;  %v430_v25 = vpop.f32.mrf.mxu2 }
  0xb4   : > { %v406_v43 = vpop.f32.mrf.mxu0  ;;  %v471_v44 = vpop.f32.mrf.mxu1  ;;  %v493_v28 = vadd.f32 %v492_v17, %v1618_v24  ;;  %v431_v32 = vadd.f32 %v430_v25, %v1616_v21 }
  0xb5   : > { %v407_v45 = vadd.f32 %v406_v43, %v1616_v21  ;;  %v472_v46 = vadd.f32 %v471_v44, %v1618_v24 }
  0xb6   : > { %v531_v30 = vmax.f32 %v493_v28, 0.0  ;;  %v532_v35 = vmax.f32 %v431_v32, 0.0 }
  0xb7   : > { %v516_v47 = vmax.f32 %v407_v45, 0.0  ;;  %v517_v48 = vmax.f32 %v472_v46, 0.0 }
  0xb9   : > { %637 = vmatmul.f32.gmra.mxu2 %v516_v47  ;;  %767 = vmatmul.f32.gmra.mxu0 %v516_v47 }
  0xba   : > { %702 = vmatmul.f32.gmra.mxu3 %v517_v48  ;;  %832 = vmatmul.f32.gmra.mxu1 %v517_v48 }
  0xbb   : > { %v495_v26 = vpop.f32.mrf.mxu3  ;;  %v433_v31 = vpop.f32.mrf.mxu2 }
  0xbc   : > { %v409_v49 = vpop.f32.mrf.mxu0  ;;  %v474_v50 = vpop.f32.mrf.mxu1  ;;  %v496_v34 = vadd.f32 %v495_v26, %v1618_v24  ;;  %v434_v37 = vadd.f32 %v433_v31, %v1616_v21 }
  0xbd   : > { %v410_v51 = vadd.f32 %v409_v49, %v1616_v21  ;;  %v475_v52 = vadd.f32 %v474_v50, %v1618_v24 }
  0xbe   : > { %v533_v36 = vmax.f32 %v496_v34, 0.0  ;;  %v534_v41 = vmax.f32 %v434_v37, 0.0 }
  0xbf   : > { %v518_v53 = vmax.f32 %v410_v51, 0.0  ;;  %v519_v54 = vmax.f32 %v475_v52, 0.0 }
  0xc1   : > { %640 = vmatmul.f32.gmra.mxu2 %v518_v53  ;;  %770 = vmatmul.f32.gmra.mxu0 %v518_v53 }
  0xc2   : > { %705 = vmatmul.f32.gmra.mxu3 %v519_v54  ;;  %835 = vmatmul.f32.gmra.mxu1 %v519_v54 }
  0xc3   : > { %v498_v33 = vpop.f32.mrf.mxu3 }
  0xc4   : > { %v412_v55 = vpop.f32.mrf.mxu0  ;;  %v477_v56 = vpop.f32.mrf.mxu1  ;;  %v499_v38 = vadd.f32 %v498_v33, %v1618_v24 }
  0xc5   : > { %v413_v57 = vadd.f32 %v412_v55, %v1616_v21  ;;  %v478_v58 = vadd.f32 %v477_v56, %v1618_v24  ;;  %v436_v39 = vpop.f32.mrf.mxu2 }
  0xc6   : > { %v535_v42 = vmax.f32 %v499_v38, 0.0  ;;  %v437_v43 = vadd.f32 %v436_v39, %v1616_v21 }
  0xc7   : > { %v520_v59 = vmax.f32 %v413_v57, 0.0  ;;  %v521_v60 = vmax.f32 %v478_v58, 0.0 }
  0xc8   : > { %v536_v46 = vmax.f32 %v437_v43, 0.0 }
  0xc9   : > { %643 = vmatmul.f32.gmra.mxu2 %v520_v59  ;;  %773 = vmatmul.f32.gmra.mxu0 %v520_v59  ;;  %v606_v59 = vld [vmem:[%s1813_s4] sm:$0x3] }
  0xca   : > { %708 = vmatmul.f32.gmra.mxu3 %v521_v60  ;;  %838 = vmatmul.f32.gmra.mxu1 %v521_v60  ;;  %v1655_v60 = vperm.slane %v606_v59, 1 }
  0xcb   : > { %v501_v40 = vpop.f32.mrf.mxu3 }
  0xcc   : > { %v415_v62 = vpop.f32.mrf.mxu0  ;;  %v480_v63 = vpop.f32.mrf.mxu1  ;;  %v502_v44 = vadd.f32 %v501_v40, %v1618_v24 }
  0xcd   : > { %v416_v0 = vadd.f32 %v415_v62, %v1616_v21  ;;  %v481_v1 = vadd.f32 %v480_v63, %v1618_v24  ;;  %v439_v45 = vpop.f32.mrf.mxu2 }
  0xce   : > { %v537_v48 = vmax.f32 %v502_v44, 0.0  ;;  %v440_v49 = vadd.f32 %v439_v45, %v1616_v21 }
  0xcf   : > { %v522_v2 = vmax.f32 %v416_v0, 0.0  ;;  %v523_v3 = vmax.f32 %v481_v1, 0.0 }
  0xd0   : > { %v538_v51 = vmax.f32 %v440_v49, 0.0 }
  0xd1   : > { %646 = vmatmul.f32.gmra.mxu2 %v522_v2  ;;  %776 = vmatmul.f32.gmra.mxu0 %v522_v2 }
  0xd2   : > { %711 = vmatmul.f32.gmra.mxu3 %v523_v3  ;;  %841 = vmatmul.f32.gmra.mxu1 %v523_v3 }
  0xd3   : > { %v504_v47 = vpop.f32.mrf.mxu3 }
  0xd4   : > { %v418_v6 = vpop.f32.mrf.mxu0  ;;  %v483_v7 = vpop.f32.mrf.mxu1  ;;  %v505_v50 = vadd.f32 %v504_v47, %v1618_v24 }
  0xd5   : > { %v419_v8 = vadd.f32 %v418_v6, %v1616_v21  ;;  %v484_v9 = vadd.f32 %v483_v7, %v1618_v24  ;;  %v442_v53 = vpop.f32.mrf.mxu2 }
  0xd6   : > { %v539_v52 = vmax.f32 %v505_v50, 0.0  ;;  %v443_v55 = vadd.f32 %v442_v53, %v1616_v21 }
  0xd7   : > { %v524_v11 = vmax.f32 %v419_v8, 0.0  ;;  %v525_v10 = vmax.f32 %v484_v9, 0.0 }
  0xd8   : > { %v540_v57 = vmax.f32 %v443_v55, 0.0 }
  0xd9   : > { %649 = vmatmul.f32.gmra.mxu2 %v524_v11  ;;  %779 = vmatmul.f32.gmra.mxu0 %v524_v11 }
  0xda   : > { %714 = vmatmul.f32.gmra.mxu3 %v525_v10  ;;  %844 = vmatmul.f32.gmra.mxu1 %v525_v10 }
  0xdb   : > { %v507_v54 = vpop.f32.mrf.mxu3 }
  0xdc   : > { %v421_v13 = vpop.f32.mrf.mxu0  ;;  %v508_v56 = vadd.f32 %v507_v54, %v1618_v24  ;;  %v904_v24 = vld [vmem:[%s1814_s5] sm:$0x3] }
  0xdd   : > { %v422_v15 = vadd.f32 %v421_v13, %v1616_v21  ;;  %v1658_v21 = vperm.slane %v606_v59, 0  ;;  %v1664_v5 = vperm.slane %v904_v24, 1  ;;  %v1667_v11 = vperm.slane %v904_v24, 0 }
  0xde   : > { %v541_v58 = vmax.f32 %v508_v56, 0.0 }
  0xdf   : > { %v526_v19 = vmax.f32 %v422_v15, 0.0 }
  0xe1   : > { %652 = vmatmul.f32.gmra.mxu2 %v526_v19  ;;  %782 = vmatmul.f32.gmra.mxu0 %v526_v19 }
  0xe2   : > { %717 = vmatmul.f32.gmra.mxu3 %v527_v18  ;;  %847 = vmatmul.f32.gmra.mxu1 %v527_v18 }
  0xe9   : > { %655 = vmatmul.f32.gmra.mxu2 %v528_v23  ;;  %785 = vmatmul.f32.gmra.mxu0 %v528_v23 }
  0xea   : > { %720 = vmatmul.f32.gmra.mxu3 %v529_v16  ;;  %850 = vmatmul.f32.gmra.mxu1 %v529_v16 }
  0xf1   : > { %658 = vmatmul.f32.gmra.mxu2 %v530_v29  ;;  %788 = vmatmul.f32.gmra.mxu0 %v530_v29 }
  0xf2   : > { %723 = vmatmul.f32.gmra.mxu3 %v531_v30  ;;  %853 = vmatmul.f32.gmra.mxu1 %v531_v30 }
  0xf9   : > { %661 = vmatmul.f32.gmra.mxu2 %v532_v35  ;;  %791 = vmatmul.f32.gmra.mxu0 %v532_v35 }
  0xfa   : > { %726 = vmatmul.f32.gmra.mxu3 %v533_v36  ;;  %856 = vmatmul.f32.gmra.mxu1 %v533_v36 }
 0x101   : > { %664 = vmatmul.f32.gmra.mxu2 %v534_v41  ;;  %794 = vmatmul.f32.gmra.mxu0 %v534_v41 }
 0x102   : > { %729 = vmatmul.f32.gmra.mxu3 %v535_v42  ;;  %859 = vmatmul.f32.gmra.mxu1 %v535_v42 }
 0x109   : > { %667 = vmatmul.f32.gmra.mxu2 %v536_v46  ;;  %797 = vmatmul.f32.gmra.mxu0 %v536_v46 }
 0x10a   : > { %732 = vmatmul.f32.gmra.mxu3 %v537_v48  ;;  %862 = vmatmul.f32.gmra.mxu1 %v537_v48 }
 0x111   : > { %670 = vmatmul.f32.gmra.mxu2 %v538_v51  ;;  %800 = vmatmul.f32.gmra.mxu0 %v538_v51 }
 0x112   : > { %735 = vmatmul.f32.gmra.mxu3 %v539_v52  ;;  %865 = vmatmul.f32.gmra.mxu1 %v539_v52 }
 0x119   : > { %673 = vmatmul.f32.gmra.mxu2 %v540_v57 }
 0x11a   : > { %738 = vmatmul.f32.gmra.mxu3 %v541_v58  ;;  %868 = vmatmul.f32.gmra.mxu1 %v541_v58 }
 0x11e   : > { %v759_v61 = vpop.f32.mrf.mxu0 }
 0x11f   : > { %v760_v62 = vadd.f32 %v759_v61, %v1655_v60  ;;  %v824_v63 = vpop.f32.mrf.mxu1 }
 0x121   : > { %803 = vmatmul.f32.vlgmr.msra.gmra.mxu2 %v540_v57  ;;  %v825_v0 = vadd.f32 %v824_v63, %v760_v62 }
 0x123   : > { %v873_v6 = vmax.f32 %v825_v0, 0.0 }
 0x124   : > { %v629_v1 = vpop.f32.mrf.mxu2 }
 0x125   : > { %v630_v2 = vadd.f32 %v629_v1, %v1658_v21  ;;  %v694_v3 = vpop.f32.mrf.mxu3  ;;  %v911_v14 = vmul.f32 %v1664_v5, %v873_v6 }
 0x126   : > { %v762_v4 = vpop.f32.mrf.mxu0 }
 0x127   : > { %v695_v7 = vadd.f32 %v694_v3, %v630_v2  ;;  %v763_v8 = vadd.f32 %v762_v4, %v1655_v60  ;;  %v827_v9 = vpop.f32.mrf.mxu1 }
 0x129   : > { %v872_v10 = vmax.f32 %v695_v7, 0.0  ;;  %v828_v12 = vadd.f32 %v827_v9, %v763_v8 }
 0x12b   : > { %v910_v13 = vmul.f32 %v1667_v11, %v872_v10  ;;  %v875_v22 = vmax.f32 %v828_v12, 0.0 }
 0x12c   : > { %v632_v15 = vpop.f32.mrf.mxu2 }
 0x12d   : > { %v633_v17 = vadd.f32 %v632_v15, %v1658_v21  ;;  %v697_v18 = vpop.f32.mrf.mxu3  ;;  %v942_v19 = vadd.f32 %v911_v14, %v910_v13  ;;  %v913_v27 = vmul.f32 %v1664_v5, %v875_v22 }
 0x12e   : > { %v765_v20 = vpop.f32.mrf.mxu0 }
 0x12f   : > { %v698_v23 = vadd.f32 %v697_v18, %v633_v17  ;;  %v766_v16 = vadd.f32 %v765_v20, %v1655_v60  ;;  %943 = vadd.xlane.f32.xlu0 %v942_v19  ;;  %v830_v25 = vpop.f32.mrf.mxu1 }
 0x131   : > { %v874_v26 = vmax.f32 %v698_v23, 0.0  ;;  %v831_v29 = vadd.f32 %v830_v25, %v766_v16 }
 0x133   : > { %v912_v28 = vmul.f32 %v1667_v11, %v874_v26  ;;  %v877_v35 = vmax.f32 %v831_v29, 0.0 }
 0x134   : > { %v635_v30 = vpop.f32.mrf.mxu2 }
 0x135   : > { %v636_v31 = vadd.f32 %v635_v30, %v1658_v21  ;;  %v700_v32 = vpop.f32.mrf.mxu3  ;;  %v945_v33 = vadd.f32 %v913_v27, %v912_v28  ;;  %v915_v42 = vmul.f32 %v1664_v5, %v877_v35 }
 0x136   : > { %v768_v34 = vpop.f32.mrf.mxu0 }
 0x137   : > { %v701_v36 = vadd.f32 %v700_v32, %v636_v31  ;;  %v769_v37 = vadd.f32 %v768_v34, %v1655_v60  ;;  %946 = vadd.xlane.f32.xlu0 %v945_v33  ;;  %v833_v38 = vpop.f32.mrf.mxu1 }
 0x139   : > { %v876_v39 = vmax.f32 %v701_v36, 0.0  ;;  %v834_v40 = vadd.f32 %v833_v38, %v769_v37 }
 0x13b   : > { %v914_v41 = vmul.f32 %v1667_v11, %v876_v39  ;;  %v879_v48 = vmax.f32 %v834_v40, 0.0 }
 0x13c   : > { %v638_v43 = vpop.f32.mrf.mxu2 }
 0x13d   : > { %v639_v44 = vadd.f32 %v638_v43, %v1658_v21  ;;  %v703_v45 = vpop.f32.mrf.mxu3  ;;  %v948_v46 = vadd.f32 %v915_v42, %v914_v41  ;;  %v917_v53 = vmul.f32 %v1664_v5, %v879_v48 }
 0x13e   : > { %v771_v47 = vpop.f32.mrf.mxu0 }
 0x13f   : > { %v704_v49 = vadd.f32 %v703_v45, %v639_v44  ;;  %v772_v50 = vadd.f32 %v771_v47, %v1655_v60  ;;  %949 = vadd.xlane.f32.xlu1 %v948_v46  ;;  %v836_v51 = vpop.f32.mrf.mxu1 }
 0x141   : > { %v878_v52 = vmax.f32 %v704_v49, 0.0  ;;  %v837_v55 = vadd.f32 %v836_v51, %v772_v50 }
 0x143   : > { %v916_v54 = vmul.f32 %v1667_v11, %v878_v52  ;;  %v881_v62 = vmax.f32 %v837_v55, 0.0 }
 0x144   : > { %v641_v56 = vpop.f32.mrf.mxu2 }
 0x145   : > { %v642_v57 = vadd.f32 %v641_v56, %v1658_v21  ;;  %v706_v58 = vpop.f32.mrf.mxu3  ;;  %v951_v59 = vadd.f32 %v917_v53, %v916_v54  ;;  %v919_v4 = vmul.f32 %v1664_v5, %v881_v62 }
 0x146   : > { %v774_v61 = vpop.f32.mrf.mxu0 }
 0x147   : > { %v707_v63 = vadd.f32 %v706_v58, %v642_v57  ;;  %v775_v0 = vadd.f32 %v774_v61, %v1655_v60  ;;  %952 = vadd.xlane.f32.xlu1 %v951_v59  ;;  %v839_v24 = vpop.f32.mrf.mxu1 }
 0x149   : > { %v880_v1 = vmax.f32 %v707_v63, 0.0  ;;  %v840_v2 = vadd.f32 %v839_v24, %v775_v0 }
 0x14b   : > { %v918_v3 = vmul.f32 %v1667_v11, %v880_v1  ;;  %v883_v12 = vmax.f32 %v840_v2, 0.0 }
 0x14c   : > { %v644_v6 = vpop.f32.mrf.mxu2 }
 0x14d   : > { %v645_v7 = vadd.f32 %v644_v6, %v1658_v21  ;;  %v709_v8 = vpop.f32.mrf.mxu3  ;;  %v954_v9 = vadd.f32 %v919_v4, %v918_v3  ;;  %v921_v18 = vmul.f32 %v1664_v5, %v883_v12 }
 0x14e   : > { %v777_v10 = vpop.f32.mrf.mxu0 }
 0x14f   : > { %v710_v13 = vadd.f32 %v709_v8, %v645_v7  ;;  %v778_v14 = vadd.f32 %v777_v10, %v1655_v60  ;;  %955 = vadd.xlane.f32.xlu2 %v954_v9  ;;  %v842_v15 = vpop.f32.mrf.mxu1 }
 0x151   : > { %v882_v17 = vmax.f32 %v710_v13, 0.0  ;;  %v843_v20 = vadd.f32 %v842_v15, %v778_v14 }
 0x153   : > { %v920_v19 = vmul.f32 %v1667_v11, %v882_v17  ;;  %v885_v27 = vmax.f32 %v843_v20, 0.0 }
 0x154   : > { %v647_v22 = vpop.f32.mrf.mxu2 }
 0x155   : > { %v648_v23 = vadd.f32 %v647_v22, %v1658_v21  ;;  %v712_v16 = vpop.f32.mrf.mxu3  ;;  %v957_v25 = vadd.f32 %v921_v18, %v920_v19  ;;  %v923_v32 = vmul.f32 %v1664_v5, %v885_v27 }
 0x156   : > { %v780_v26 = vpop.f32.mrf.mxu0 }
 0x157   : > { %v713_v28 = vadd.f32 %v712_v16, %v648_v23  ;;  %v781_v29 = vadd.f32 %v780_v26, %v1655_v60  ;;  %958 = vadd.xlane.f32.xlu2 %v957_v25  ;;  %v845_v30 = vpop.f32.mrf.mxu1 }
 0x159   : > { %v884_v31 = vmax.f32 %v713_v28, 0.0  ;;  %v846_v34 = vadd.f32 %v845_v30, %v781_v29 }
 0x15b   : > { %v922_v33 = vmul.f32 %v1667_v11, %v884_v31  ;;  %v887_v40 = vmax.f32 %v846_v34, 0.0 }
 0x15c   : > { %v650_v35 = vpop.f32.mrf.mxu2 }
 0x15d   : > { %v651_v36 = vadd.f32 %v650_v35, %v1658_v21  ;;  %v715_v37 = vpop.f32.mrf.mxu3  ;;  %v960_v38 = vadd.f32 %v923_v32, %v922_v33  ;;  %v925_v45 = vmul.f32 %v1664_v5, %v887_v40 }
 0x15e   : > { %v783_v39 = vpop.f32.mrf.mxu0 }
 0x15f   : > { %v716_v41 = vadd.f32 %v715_v37, %v651_v36  ;;  %v784_v42 = vadd.f32 %v783_v39, %v1655_v60  ;;  %961 = vadd.xlane.f32.xlu0 %v960_v38  ;;  %v848_v43 = vpop.f32.mrf.mxu1 }
 0x161   : > { %v886_v44 = vmax.f32 %v716_v41, 0.0  ;;  %v849_v47 = vadd.f32 %v848_v43, %v784_v42 }
 0x163   : > { %v924_v46 = vmul.f32 %v1667_v11, %v886_v44  ;;  %v889_v53 = vmax.f32 %v849_v47, 0.0 }
 0x164   : > { %v653_v48 = vpop.f32.mrf.mxu2 }
 0x165   : > { %v654_v49 = vadd.f32 %v653_v48, %v1658_v21  ;;  %v718_v50 = vpop.f32.mrf.mxu3  ;;  %v963_v51 = vadd.f32 %v925_v45, %v924_v46  ;;  %v927_v58 = vmul.f32 %v1664_v5, %v889_v53 }
 0x166   : > { %v786_v52 = vpop.f32.mrf.mxu0 }
 0x167   : > { %v719_v54 = vadd.f32 %v718_v50, %v654_v49  ;;  %v787_v55 = vadd.f32 %v786_v52, %v1655_v60  ;;  %964 = vadd.xlane.f32.xlu1 %v963_v51  ;;  %v851_v56 = vpop.f32.mrf.mxu1 }
 0x169   : > { %v888_v57 = vmax.f32 %v719_v54, 0.0  ;;  %v852_v61 = vadd.f32 %v851_v56, %v787_v55 }
 0x16b   : > { %v926_v59 = vmul.f32 %v1667_v11, %v888_v57  ;;  %v891_v2 = vmax.f32 %v852_v61, 0.0 }
 0x16c   : > { %v656_v62 = vpop.f32.mrf.mxu2 }
 0x16d   : > { %v657_v63 = vadd.f32 %v656_v62, %v1658_v21  ;;  %v721_v0 = vpop.f32.mrf.mxu3  ;;  %v966_v24 = vadd.f32 %v927_v58, %v926_v59  ;;  %v929_v8 = vmul.f32 %v1664_v5, %v891_v2 }
 0x16e   : > { %v789_v1 = vpop.f32.mrf.mxu0 }
 0x16f   : > { %v722_v3 = vadd.f32 %v721_v0, %v657_v63  ;;  %v790_v4 = vadd.f32 %v789_v1, %v1655_v60  ;;  %967 = vadd.xlane.f32.xlu2 %v966_v24  ;;  %v854_v6 = vpop.f32.mrf.mxu1 }
 0x171   : > { %v890_v7 = vmax.f32 %v722_v3, 0.0  ;;  %v855_v10 = vadd.f32 %v854_v6, %v790_v4 }
 0x173   : > { %v928_v9 = vmul.f32 %v1667_v11, %v890_v7  ;;  %v893_v18 = vmax.f32 %v855_v10, 0.0 }
 0x174   : > { %v659_v12 = vpop.f32.mrf.mxu2 }
 0x175   : > { %v660_v13 = vadd.f32 %v659_v12, %v1658_v21  ;;  %v724_v14 = vpop.f32.mrf.mxu3  ;;  %v969_v15 = vadd.f32 %v929_v8, %v928_v9  ;;  %v931_v16 = vmul.f32 %v1664_v5, %v893_v18 }
 0x176   : > { %v792_v17 = vpop.f32.mrf.mxu0 }
 0x177   : > { %v725_v19 = vadd.f32 %v724_v14, %v660_v13  ;;  %v793_v20 = vadd.f32 %v792_v17, %v1655_v60  ;;  %970 = vadd.xlane.f32.xlu0 %v969_v15  ;;  %v857_v22 = vpop.f32.mrf.mxu1 }
 0x179   : > { %v892_v23 = vmax.f32 %v725_v19, 0.0  ;;  %v858_v26 = vadd.f32 %v857_v22, %v793_v20 }
 0x17b   : > { %v930_v25 = vmul.f32 %v1667_v11, %v892_v23  ;;  %v895_v32 = vmax.f32 %v858_v26, 0.0 }
 0x17c   : > { %v662_v27 = vpop.f32.mrf.mxu2 }
 0x17d   : > { %v663_v28 = vadd.f32 %v662_v27, %v1658_v21  ;;  %v727_v29 = vpop.f32.mrf.mxu3  ;;  %v972_v30 = vadd.f32 %v931_v16, %v930_v25  ;;  %v933_v37 = vmul.f32 %v1664_v5, %v895_v32 }
 0x17e   : > { %v795_v31 = vpop.f32.mrf.mxu0 }
 0x17f   : > { %v728_v33 = vadd.f32 %v727_v29, %v663_v28  ;;  %v796_v34 = vadd.f32 %v795_v31, %v1655_v60  ;;  %973 = vadd.xlane.f32.xlu1 %v972_v30  ;;  %v860_v35 = vpop.f32.mrf.mxu1 }
 0x181   : > { %v894_v36 = vmax.f32 %v728_v33, 0.0  ;;  %v861_v39 = vadd.f32 %v860_v35, %v796_v34  ;;  %v1024_v34 = vlaneseq }
 0x183   : > { %v932_v38 = vmul.f32 %v1667_v11, %v894_v36  ;;  %v897_v45 = vmax.f32 %v861_v39, 0.0 }
 0x184   : > { %v665_v40 = vpop.f32.mrf.mxu2 }
 0x185   : > { %v666_v41 = vadd.f32 %v665_v40, %v1658_v21  ;;  %v730_v42 = vpop.f32.mrf.mxu3  ;;  %v975_v43 = vadd.f32 %v933_v37, %v932_v38  ;;  %v935_v50 = vmul.f32 %v1664_v5, %v897_v45  ;;  %v1730_v37 = vand.u32 127, %v1024_v34 }
 0x186   : > { %v798_v44 = vpop.f32.mrf.mxu0  ;;  %v1732_v38 = vstv %s990_s14 }
 0x187   : > { %v731_v46 = vadd.f32 %v730_v42, %v666_v41  ;;  %v799_v47 = vadd.f32 %v798_v44, %v1655_v60  ;;  %976 = vadd.xlane.f32.xlu2 %v975_v43  ;;  %v863_v48 = vpop.f32.mrf.mxu1  ;;  %v1031_v40 = vadd.s32 4294967280, %v1730_v37  ;;  %v1035_v42 = vadd.s32 4294967272, %v1730_v37 }
 0x188   : > { %v1083_v34 = vadd.s32 4294967176, %v1730_v37 }
 0x189   : > { %v896_v49 = vmax.f32 %v731_v46, 0.0  ;;  %v864_v52 = vadd.f32 %v863_v48, %v799_v47  ;;  %v1039_v47 = vadd.s32 4294967264, %v1730_v37 }
 0x18b   : > { %v934_v51 = vmul.f32 %v1667_v11, %v896_v49  ;;  %v899_v58 = vmax.f32 %v864_v52, 0.0 }
 0x18c   : > { %v668_v53 = vpop.f32.mrf.mxu2 }
 0x18d   : > { %v669_v54 = vadd.f32 %v668_v53, %v1658_v21  ;;  %v733_v55 = vpop.f32.mrf.mxu3  ;;  %v978_v56 = vadd.f32 %v935_v50, %v934_v51  ;;  %v937_v0 = vmul.f32 %v1664_v5, %v899_v58  ;;  %v1043_v53 = vadd.s32 4294967256, %v1730_v37 }
 0x18e   : > { %v801_v57 = vpop.f32.mrf.mxu0 }
 0x18f   : > { %v734_v59 = vadd.f32 %v733_v55, %v669_v54  ;;  %v802_v61 = vadd.f32 %v801_v57, %v1655_v60  ;;  %979 = vadd.xlane.f32.xlu0 %v978_v56  ;;  %v866_v62 = vpop.f32.mrf.mxu1  ;;  %v1047_v56 = vadd.s32 4294967248, %v1730_v37 }
 0x191   : > { %v898_v63 = vmax.f32 %v734_v59, 0.0  ;;  %v867_v1 = vadd.f32 %v866_v62, %v802_v61  ;;  %v1051_v59 = vadd.s32 4294967240, %v1730_v37 }
 0x193   : > { %v936_v24 = vmul.f32 %v1667_v11, %v898_v63  ;;  %v901_v7 = vmax.f32 %v867_v1, 0.0  ;;  %v1055_v63 = vadd.s32 4294967232, %v1730_v37 }
 0x194   : > { %v671_v2 = vpop.f32.mrf.mxu2 }
 0x195   : > { %v672_v3 = vadd.f32 %v671_v2, %v1658_v21  ;;  %v736_v4 = vpop.f32.mrf.mxu3  ;;  %v981_v6 = vadd.f32 %v937_v0, %v936_v24  ;;  %v939_v10 = vmul.f32 %v1664_v5, %v901_v7  ;;  %v1059_v2 = vadd.s32 4294967224, %v1730_v37 }
 0x196   : > { %v1063_v7 = vadd.s32 4294967216, %v1730_v37 }
 0x197   : > { %v737_v8 = vadd.f32 %v736_v4, %v672_v3  ;;  %982 = vadd.xlane.f32.xlu1 %v981_v6  ;;  %v869_v22 = vpop.f32.mrf.mxu1 }
 0x199   : > { %v900_v9 = vmax.f32 %v737_v8, 0.0 }
 0x19b   : > { %v938_v12 = vmul.f32 %v1667_v11, %v900_v9 }
 0x19c   : > { %v674_v13 = vpop.f32.mrf.mxu2 }
 0x19d   : > { %v984_v14 = vadd.f32 %v939_v10, %v938_v12  ;;  %v675_v15 = vadd.f32 %v674_v13, %v1658_v21  ;;  %v739_v17 = vpop.f32.mrf.mxu3  ;;  %v1067_v13 = vadd.s32 4294967208, %v1730_v37 }
 0x19f   : > { %985 = vadd.xlane.f32.xlu2 %v984_v14  ;;  %v740_v18 = vadd.f32 %v739_v17, %v675_v15 }
 0x1a1   : > { %v902_v23 = vmax.f32 %v740_v18, 0.0  ;;  %v1071_v18 = vadd.s32 4294967200, %v1730_v37 }
 0x1a2   : > { %v944_v29 = vpop.xlane.xlu0 %943 }
 0x1a3   : > { %v940_v26 = vmul.f32 %v1667_v11, %v902_v23  ;;  %v1027_v11 = vadd.s32 4294967288, %v1730_v37  ;;  %v992_v39 = vadd.f32 %v1732_v38, %v944_v29  ;;  %v1075_v23 = vadd.s32 4294967192, %v1730_v37 }
 0x1a4   : > { %v804_v19 = vpop.f32.mrf.mxu2 }
 0x1a5   : > { %v805_v20 = vadd.f32 %v804_v19, %v1655_v60  ;;  %v1026_v50 = vperm.slane %v992_v39, %v1730_v37 }
 0x1a7   : > { %v870_v16 = vadd.f32 %v869_v22, %v805_v20 }
 0x1a9   : > { %v903_v25 = vmax.f32 %v870_v16, 0.0 }
 0x1aa   : > { %v947_v21 = vpop.xlane.xlu0 %946 }
 0x1ab   : > { %v941_v27 = vmul.f32 %v1664_v5, %v903_v25  ;;  %v993_v5 = vadd.f32 %v1732_v38, %v947_v21 }
 0x1ad   : > { %v987_v28 = vadd.f32 %v941_v27, %v940_v26  ;;  %v1028_v45 = vperm.slane %v993_v5, %v1027_v11  ;;  %v1079_v27 = vadd.s32 4294967184, %v1730_v37 }
 0x1af   : > { %988 = vadd.xlane.f32.xlu0 %v987_v28  ;;  %v1030_v55 = vsel %vm1029_vm2, %v1028_v45, %v1026_v50 }
 0x1b2   : > { %v950_v30 = vpop.xlane.xlu1 %949 }
 0x1b3   : > { %v994_v41 = vadd.f32 %v1732_v38, %v950_v30 }
 0x1b5   : > { %v1032_v51 = vperm.slane %v994_v41, %v1031_v40 }
 0x1b7   : > { %v1034_v62 = vsel %vm1033_vm3, %v1032_v51, %v1030_v55 }
 0x1ba   : > { %v953_v32 = vpop.xlane.xlu1 %952 }
 0x1bb   : > { %v995_v43 = vadd.f32 %v1732_v38, %v953_v32 }
 0x1bd   : > { %v1036_v52 = vperm.slane %v995_v43, %v1035_v42 }
 0x1bf   : > { %v1038_v24 = vsel %vm1037_vm4, %v1036_v52, %v1034_v62 }
 0x1c2   : > { %v956_v31 = vpop.xlane.xlu2 %955 }
 0x1c3   : > { %v996_v48 = vadd.f32 %v1732_v38, %v956_v31 }
 0x1c5   : > { %v1040_v58 = vperm.slane %v996_v48, %v1039_v47 }
 0x1c7   : > { %v1042_v10 = vsel %vm1041_vm5, %v1040_v58, %v1038_v24 }
 0x1ca   : > { %v959_v33 = vpop.xlane.xlu2 %958 }
 0x1cb   : > { %v997_v54 = vadd.f32 %v1732_v38, %v959_v33 }
 0x1cd   : > { %v1044_v1 = vperm.slane %v997_v54, %v1043_v53 }
 0x1cf   : > { %v1046_v20 = vsel %vm1045_vm6, %v1044_v1, %v1042_v10 }
 0x1d2   : > { %v962_v35 = vpop.xlane.xlu0 %961 }
 0x1d3   : > { %v998_v57 = vadd.f32 %v1732_v38, %v962_v35 }
 0x1d5   : > { %v1048_v6 = vperm.slane %v998_v57, %v1047_v56 }
 0x1d7   : > { %v1050_v25 = vsel %vm1049_vm7, %v1048_v6, %v1046_v20 }
 0x1da   : > { %v965_v60 = vpop.xlane.xlu1 %964 }
 0x1db   : > { %v999_v61 = vadd.f32 %v1732_v38, %v965_v60 }
 0x1dd   : > { %v1052_v12 = vperm.slane %v999_v61, %v1051_v59 }
 0x1df   : > { %v1054_v29 = vsel %vm1053_vm8, %v1052_v12, %v1050_v25 }
 0x1e2   : > { %v968_v36 = vpop.xlane.xlu2 %967 }
 0x1e3   : > { %v1000_v0 = vadd.f32 %v1732_v38, %v968_v36 }
 0x1e5   : > { %v1056_v17 = vperm.slane %v1000_v0, %v1055_v63 }
 0x1e7   : > { %v1058_v31 = vsel %vm1057_vm9, %v1056_v17, %v1054_v29 }
 0x1ea   : > { %v971_v44 = vpop.xlane.xlu0 %970 }
 0x1eb   : > { %v1001_v3 = vadd.f32 %v1732_v38, %v971_v44 }
 0x1ed   : > { %v1060_v22 = vperm.slane %v1001_v3, %v1059_v2 }
 0x1ef   : > { %v1062_v32 = vsel %vm1061_vm10, %v1060_v22, %v1058_v31 }
 0x1f2   : > { %v974_v46 = vpop.xlane.xlu1 %973 }
 0x1f3   : > { %v1002_v8 = vadd.f32 %v1732_v38, %v974_v46 }
 0x1f5   : > { %v1064_v26 = vperm.slane %v1002_v8, %v1063_v7 }
 0x1f7   : > { %v1066_v35 = vsel %vm1065_vm11, %v1064_v26, %v1062_v32 }
 0x1fa   : > { %v977_v49 = vpop.xlane.xlu2 %976 }
 0x1fb   : > { %v1003_v14 = vadd.f32 %v1732_v38, %v977_v49 }
 0x1fd   : > { %v1068_v30 = vperm.slane %v1003_v14, %v1067_v13 }
 0x1ff   : > { %v1070_v11 = vsel %vm1069_vm12, %v1068_v30, %v1066_v35 }
 0x202   : > { %v980_v4 = vpop.xlane.xlu0 %979 }
 0x203   : > { %v1004_v19 = vadd.f32 %v1732_v38, %v980_v4 }
 0x205   : > { %v1072_v21 = vperm.slane %v1004_v19, %v1071_v18 }
 0x207   : > { %v1074_v39 = vsel %vm1073_vm13, %v1072_v21, %v1070_v11 }
 0x20a   : > { %v983_v9 = vpop.xlane.xlu1 %982 }
 0x20b   : > { %v1005_v16 = vadd.f32 %v1732_v38, %v983_v9 }
 0x20d   : > { %v1076_v33 = vperm.slane %v1005_v16, %v1075_v23 }
 0x20f   : > { %v1078_v40 = vsel %vm1077_vm14, %v1076_v33, %v1074_v39 }
 0x212   : > { %v986_v15 = vpop.xlane.xlu2 %985 }
 0x213   : > { %v1006_v28 = vadd.f32 %v1732_v38, %v986_v15 }
 0x215   : > { %v1080_v60 = vperm.slane %v1006_v28, %v1079_v27 }
 0x217   : > { %v1082_v42 = vsel %vm1081_vm15, %v1080_v60, %v1078_v40 }
 0x222   : > { %v989_v36 = vpop.xlane.xlu0 %988 }
 0x223   : > { %v1007_v5 = vadd.f32 %v1732_v38, %v989_v36 }
 0x225   : > { %v1084_v41 = vperm.slane %v1007_v5, %v1083_v34 }
 0x227   : > { %v1086_v37 = vsel %vm1085_vm0, %v1084_v41, %v1082_v42 }
 0x228   : > { %1088 = vst [vmem:[%s289_s19] sm:$0x1] %v1086_v37 }
 0x229   : > { %1344 = shalt.err (!%p1341_p8)
}
 0x22a   : > { %1239 = dma.vmem_to_hbm [thread:$0]  (%p1469_p5), %s1101_s20, 16, %s1103_s6, %s1090_s21  }
 0x22b PF: > { %p1251_p9 = scmp.ge.s32.totalorder %s1383_s29, 2  ;;  %s1114_s14 = sand.u32 1, %s1371_s26  }
 0x22c   : > { %s1115_s15 = scalar_lea.sflag [#allocation5], %s1114_s14 }
 0x22d   : > { %p1246_p10 = pnand %p1251_p9, %p1473_p6 }
 0x22f   : > { %p1247_p11 = pneg %p1246_p10 }
 0x231   : > { %1366 = dma.done.wait (%p1247_p11), %s1115_s15, 16  }
 0x232   : > { %1368 = vsyncadd (%p1247_p11), %s1115_s15, 4294967280  ;;  %p19_p12 = scmp.ge.s32.totalorder %s1456_s8, 4   ;;  %s1819_s26 = smov %s1375_s27 }
 0x233   : > { %s1820_s27 = smov %s1379_s28  ;;  %s1821_s28 = smov %s1467_s11 }
 0x234   : > { %s1822_s29 = smov %s1456_s8  ;;  %21 = sbr.rel (!%p19_p12) target bundleno = 6 (0x6), region = 88 }
 0x239   :  { %1120 = vsyncpa [#allocation4], 1 }
 0x23a   :  { %1122 = vsyncpa [#allocation4 + $0x1], 1 }
 0x23b   :  { %1123 = vsyncpa [#allocation5], 1 }
 0x23c   :  { %1125 = vsyncpa [#allocation5 + $0x1], 1 }

</bundles_post_ra>
